<compile_context>
chip_gen: v6e
topology: v6e:2x2x1
jax: 0.10.0
libtpu: 0.0.40
codegen_flags: <defaults>
</compile_context>

<pallas_src>
import math

import jax
import jax.numpy as jnp
from jax.experimental import pallas as pl
from jax.experimental.pallas import tpu as pltpu

CFG = dict(emb_dim=128, mlp_hidd_dim=256, context_length=16)


# ----------------------------- kernel -----------------------------
def mlp_kernel(x_ref, w1_ref, b1_ref, w2_ref, b2_ref, o_ref):
    x = x_ref[...].astype(jnp.float32)                                   # (tm, C)

    h = jnp.dot(x, w1_ref[...], preferred_element_type=jnp.float32) + b1_ref[...]
    # exact (erf-based) GELU, matching torch.nn.GELU() default
    h = 0.5 * h * (1.0 + jax.lax.erf(h * (1.0 / math.sqrt(2.0))))

    out = jnp.dot(h, w2_ref[...], preferred_element_type=jnp.float32) + b2_ref[...]
    o_ref[...] = out.astype(o_ref.dtype)


# ----------------------------- wrapper -----------------------------
def mlp_forward(x, w1, b1, w2, b2):
    orig_shape = x.shape
    C, F = w1.shape
    assert orig_shape[-1] == C and w2.shape == (F, C)

    # Collapse all leading dims into one lane-dense row axis.
    x2 = x.reshape(-1, C)
    M = x2.shape[0]

    # Two row blocks when cleanly divisible (keeps both v7x TensorCores busy
    # via the "parallel" grid axis); otherwise a single full-extent block.
    n_blocks = 2 if (M >= 16 and M % 16 == 0) else 1
    tm = M // n_blocks

    # 2-D biases: clean (sublane=1, lane=*) layout.
    b1_2d = b1.reshape(1, F)
    b2_2d = b2.reshape(1, C)

    out2 = pl.pallas_call(
        mlp_kernel,
        out_shape=jax.ShapeDtypeStruct((M, C), x.dtype),
        grid_spec=pltpu.PrefetchScalarGridSpec(
            num_scalar_prefetch=0,
            grid=(n_blocks,),
            in_specs=[
                pl.BlockSpec((tm, C), lambda i: (i, 0)),   # x row block
                pl.BlockSpec((C, F), lambda i: (0, 0)),    # W1 (resident)
                pl.BlockSpec((1, F), lambda i: (0, 0)),    # b1
                pl.BlockSpec((F, C), lambda i: (0, 0)),    # W2 (resident)
                pl.BlockSpec((1, C), lambda i: (0, 0)),    # b2
            ],
            out_specs=pl.BlockSpec((tm, C), lambda i: (i, 0)),
        ),
        compiler_params=pltpu.CompilerParams(
            dimension_semantics=("parallel",)),
    )(x2, w1, b1_2d, w2, b2_2d)

    return out2.reshape(orig_shape)


# ----------------------------- reference (plain JAX) -----------------------------
def reference_mlp(x, w1, b1, w2, b2):
    h = x @ w1 + b1
    h = 0.5 * h * (1.0 + jax.lax.erf(h / math.sqrt(2.0)))
    return h @ w2 + b2


# ----------------------------- main -----------------------------
if __name__ == "__main__":
    cfg = CFG
    B, T = 2, cfg["context_length"]
    C, F = cfg["emb_dim"], cfg["mlp_hidd_dim"]

    key = jax.random.PRNGKey(0)
    k_w1, k_b1, k_w2, k_b2, k_x = jax.random.split(key, 5)
    s = 0.02
    w1 = s * jax.random.normal(k_w1, (C, F), jnp.float32)
    b1 = s * jax.random.normal(k_b1, (F,), jnp.float32)
    w2 = s * jax.random.normal(k_w2, (F, C), jnp.float32)
    b2 = s * jax.random.normal(k_b2, (C,), jnp.float32)
    x = jax.random.normal(k_x, (B, T, C), jnp.float32)

    out = mlp_forward(x, w1, b1, w2, b2)
    jax.block_until_ready(out)

    ref = reference_mlp(x, w1, b1, w2, b2)
    assert out.shape == (B, T, C)
    assert jnp.allclose(out, ref, atol=1e-5, rtol=1e-5), "mismatch vs JAX reference"

    print("KERNEL_OK")
</pallas_src>

<mosaic_0001>
module attributes {stable_mosaic.version = 11 : i64} {
  func.func @mlp_kernel(%arg0: i32, %arg1: memref<16x128xf32, #tpu.memory_space<vmem>>, %arg2: memref<128x256xf32, #tpu.memory_space<vmem>>, %arg3: memref<1x256xf32, #tpu.memory_space<vmem>>, %arg4: memref<256x128xf32, #tpu.memory_space<vmem>>, %arg5: memref<1x128xf32, #tpu.memory_space<vmem>>, %arg6: memref<16x128xf32, #tpu.memory_space<vmem>>) attributes {dimension_semantics = [#tpu.dimension_semantics<parallel>], iteration_bounds = array<i64: 2>, scalar_prefetch = 0 : i64, scratch_operands = 0 : i64, tpu.core_type = #tpu.core_type<tc>, window_params = [{transform_indices = @transform_0, window_bounds = array<i64: 16, 128>}, {pipeline_mode = #tpu.pipeline_mode<synchronous>, transform_indices = @transform_1, window_bounds = array<i64: 128, 256>}, {pipeline_mode = #tpu.pipeline_mode<synchronous>, transform_indices = @transform_2, window_bounds = array<i64: 1, 256>}, {pipeline_mode = #tpu.pipeline_mode<synchronous>, transform_indices = @transform_3, window_bounds = array<i64: 256, 128>}, {pipeline_mode = #tpu.pipeline_mode<synchronous>, transform_indices = @transform_4, window_bounds = array<i64: 1, 128>}, {transform_indices = @transform_5, window_bounds = array<i64: 16, 128>}]} {
    %c0 = arith.constant 0 : index
    %c0_0 = arith.constant 0 : index
    %0 = vector.load %arg1[%c0, %c0_0] : memref<16x128xf32, #tpu.memory_space<vmem>>, vector<16x128xf32>
    %c0_1 = arith.constant 0 : index
    %c0_2 = arith.constant 0 : index
    %1 = vector.load %arg2[%c0_1, %c0_2] : memref<128x256xf32, #tpu.memory_space<vmem>>, vector<128x256xf32>
    %cst = arith.constant dense<0.000000e+00> : vector<16x256xf32>
    %2 = tpu.matmul %0, %1, %cst {dimension_numbers = #tpu.dot_dimension_numbers<[1], [0], [0], [1], [0, 0, 1, 1], [], []>} : vector<16x128xf32>, vector<128x256xf32>, vector<16x256xf32> -> vector<16x256xf32>
    %c0_3 = arith.constant 0 : index
    %c0_4 = arith.constant 0 : index
    %3 = vector.load %arg3[%c0_3, %c0_4] : memref<1x256xf32, #tpu.memory_space<vmem>>, vector<1x256xf32>
    %4 = vector.broadcast %3 : vector<1x256xf32> to vector<16x256xf32>
    %5 = arith.addf %2, %4 : vector<16x256xf32>
    %cst_5 = arith.constant 5.000000e-01 : f32
    %6 = vector.broadcast %cst_5 : f32 to vector<16x256xf32>
    %7 = arith.mulf %6, %5 : vector<16x256xf32>
    %cst_6 = arith.constant 0.707106769 : f32
    %8 = vector.broadcast %cst_6 : f32 to vector<16x256xf32>
    %9 = arith.mulf %5, %8 : vector<16x256xf32>
    %10 = math.erf %9 : vector<16x256xf32>
    %cst_7 = arith.constant 1.000000e+00 : f32
    %11 = vector.broadcast %cst_7 : f32 to vector<16x256xf32>
    %12 = arith.addf %11, %10 : vector<16x256xf32>
    %13 = arith.mulf %7, %12 : vector<16x256xf32>
    %c0_8 = arith.constant 0 : index
    %c0_9 = arith.constant 0 : index
    %14 = vector.load %arg4[%c0_8, %c0_9] : memref<256x128xf32, #tpu.memory_space<vmem>>, vector<256x128xf32>
    %cst_10 = arith.constant dense<0.000000e+00> : vector<16x128xf32>
    %15 = tpu.matmul %13, %14, %cst_10 {dimension_numbers = #tpu.dot_dimension_numbers<[1], [0], [0], [1], [0, 0, 1, 1], [], []>} : vector<16x256xf32>, vector<256x128xf32>, vector<16x128xf32> -> vector<16x128xf32>
    %c0_11 = arith.constant 0 : index
    %c0_12 = arith.constant 0 : index
    %16 = vector.load %arg5[%c0_11, %c0_12] : memref<1x128xf32, #tpu.memory_space<vmem>>, vector<1x128xf32>
    %17 = vector.broadcast %16 : vector<1x128xf32> to vector<16x128xf32>
    %18 = arith.addf %15, %17 : vector<16x128xf32>
    %c0_13 = arith.constant 0 : index
    %c0_14 = arith.constant 0 : index
    %19 = vector.load %arg6[%c0_13, %c0_14] : memref<16x128xf32, #tpu.memory_space<vmem>>, vector<16x128xf32>
    tpu.vector_store %arg6[%c0_13, %c0_14], %18 {strides = array<i32>} : memref<16x128xf32, #tpu.memory_space<vmem>>, vector<16x128xf32>,
    return
  }
  func.func @transform_0(%arg0: i32) -> (i32, i32) {
    %c0_i32 = arith.constant 0 : i32
    %c0_i32_0 = arith.constant 0 : i32
    return %arg0, %c0_i32 : i32, i32
  }
  func.func @transform_1(%arg0: i32) -> (i32, i32) {
    %c0_i32 = arith.constant 0 : i32
    %c0_i32_0 = arith.constant 0 : i32
    %c0_i32_1 = arith.constant 0 : i32
    return %c0_i32, %c0_i32_0 : i32, i32
  }
  func.func @transform_2(%arg0: i32) -> (i32, i32) {
    %c0_i32 = arith.constant 0 : i32
    %c0_i32_0 = arith.constant 0 : i32
    %c0_i32_1 = arith.constant 0 : i32
    return %c0_i32, %c0_i32_0 : i32, i32
  }
  func.func @transform_3(%arg0: i32) -> (i32, i32) {
    %c0_i32 = arith.constant 0 : i32
    %c0_i32_0 = arith.constant 0 : i32
    %c0_i32_1 = arith.constant 0 : i32
    return %c0_i32, %c0_i32_0 : i32, i32
  }
  func.func @transform_4(%arg0: i32) -> (i32, i32) {
    %c0_i32 = arith.constant 0 : i32
    %c0_i32_0 = arith.constant 0 : i32
    %c0_i32_1 = arith.constant 0 : i32
    return %c0_i32, %c0_i32_0 : i32, i32
  }
  func.func @transform_5(%arg0: i32) -> (i32, i32) {
    %c0_i32 = arith.constant 0 : i32
    %c0_i32_0 = arith.constant 0 : i32
    return %arg0, %c0_i32 : i32, i32
  }
}

</mosaic_0001>

<bundles_post_ra>
// kernel: tpu_custom_call.1
= control target key start
LH: loop header
LB: loop body
LE: loop exit
PB: predicated region body
PF: predicated region fallthrough
CT: control target
= control target key end

     0   :  { %10 = vsyncpa [#allocation3], 0  ;;  %s1181_s0 = inlined_call_operand.hbm [shape: f32[32,128], index: 0, kind: input, shape index: {}]   ;;  %s1182_s1 = inlined_call_operand.hbm [shape: f32[128,256], index: 1, kind: input, shape index: {}]   ;;  %s1183_s2 = inlined_call_operand.vmem [shape: f32[1,256], index: 2, kind: input, shape index: {}]   ;;  %s1184_s3 = inlined_call_operand.hbm [shape: f32[256,128], index: 3, kind: input, shape index: {}]   ;;  %s1185_s4 = inlined_call_operand.vmem [shape: f32[1,128], index: 4, kind: input, shape index: {}]   ;;  %s1186_s5 = inlined_call_operand.hbm [shape: f32[32,128], index: 5, kind: output, shape index: {}]  }
   0x1   :  { %12 = vsyncpa [#allocation3 + $0x1], 0 }
   0x2   :  { %13 = vsyncpa [#allocation6], 0 }
   0x3   :  { %14 = vsyncpa [#allocation4], 0 }
   0x4   :  { %16 = vsyncpa [#allocation4 + $0x1], 0  ;;  %s971_s18 = smov 0   ;;  %s973_s19 = smov 0  }
   0x5   :  { %s975_s20 = smov 0   ;;  %s977_s21 = smov 0  }
   0x6 LB: > { %s992_s22 = sadd.s32 4294967295, %s928_s21   ;;  %s639_s23 = sadd.s32 4294967294, %s928_s21   ;;  %s928_s21 = sphi %s977_s21, %s1210_s21   ;;  %s924_s20 = sphi %s975_s20, %s1209_s20   ;;  %s920_s19 = sphi %s973_s19, %s1208_s19   ;;  %s916_s18 = sphi %s971_s18, %s1207_s18  }
   0x7   : > { %p42_p0 = scmp.ne.s32.totalorder %s920_s19, %s916_s18  ;;  %p1187_p1 = scmp.eq.s32.totalorder %s992_s22, 0 }
   0x8   : > { %p156_p3 = scmp.eq.s32.totalorder %s639_s23, 1  ;;  %p640_p5 = scmp.ge.s32.totalorder %s928_s21, 1 }
   0x9   : > { %p1001_p4 = por %p1187_p1, %p42_p0  ;;  %p163_p7 = scmp.lt.s32.totalorder %s928_s21, 3 }
   0xa   : > { %p1006_p6 = por %p156_p3, %p42_p0  ;;  %s930_s27 = smov [#allocation5]  }
   0xb   : > { %s1192_s24 = scalar_select %p1001_p4, 1, 0 }
   0xc   : > { %s1193_s25 = scalar_select %p1006_p6, 1, 0 }
   0xd   : > { %p1011_p8 = pnand %p640_p5, %p163_p7  ;;  %s175_s28 = sshll.u32 %s930_s27, 4  ;;  %s176_s28 = int_to_ptr.vmem [resolvable:$true] %s175_s28 }
   0xe   : > { %s931_s30 = smov [#allocation7]   ;;  %s791_s7 = scalar_lea.vmem %s176_s28, 4096 }
   0xf   : > { %s1194_s26 = scalar_select %p1011_p8, 1, 0 }
  0x10   : > { %p710_p9 = pneg %p1011_p8  ;;  %s191_s6 = sshll.u32 %s931_s30, 4  ;;  %s192_s6 = int_to_ptr.vmem [resolvable:$true] %s191_s6 }
  0x11   : > { %p792_p13 = scmp.ne.s32.totalorder %s176_s28, %s791_s7  ;;  %p799_p5 = scmp.lt.s32.totalorder %s176_s28, %s176_s28 }
  0x12   : > { %p1020_p11 = pnand %p710_p9, %p1187_p1  ;;  %p800_p7 = scmp.lt.s32.totalorder %s791_s7, %s791_s7 }
  0x14   : > { %p782_p12 = pneg %p1020_p11  ;;  %p801_p10 = por %p800_p7, %p799_p5 }
  0x16   : > { %p794_p0 = pnand %p792_p13, %p782_p12 }
  0x18   : > { %p795_p3 = pneg %p794_p0 }
  0x1a   : > { %p802_p9 = pnand %p801_p10, %p795_p3 }
  0x1c   : > { %805 = shalt.err (!%p802_p9)
}
  0x1d   : > { %s932_s8 = smov 256   ;;  %s933_s9 = smov 16  }
  0x1e   : > { %713 = dma.hbm_to_vmem [thread:$0]  (!%p1020_p11), %s1182_s1, 4096, %s176_s28, [#allocation6], %s932_s8, %s932_s8, %s933_s9  }
  0x1f   : > { %s817_s12 = scalar_lea.vmem %s192_s6, 4096  ;;  %p825_p2 = scmp.lt.s32.totalorder %s192_s6, %s192_s6 }
  0x20   : > { %p818_p1 = scmp.ne.s32.totalorder %s192_s6, %s817_s12  ;;  %p826_p6 = scmp.lt.s32.totalorder %s817_s12, %s817_s12 }
  0x22   : > { %p820_p13 = pnand %p818_p1, %p782_p12  ;;  %p827_p5 = por %p826_p6, %p825_p2 }
  0x24   : > { %p821_p0 = pneg %p820_p13 }
  0x26   : > { %p828_p10 = pnand %p827_p5, %p821_p0 }
  0x28   : > { %831 = shalt.err (!%p828_p10)
}
  0x29   : > { %s1188_s13 = smov 128   ;;  %s935_s14 = smov 8  }
  0x2a   : > { %716 = dma.hbm_to_vmem [thread:$0]  (!%p1020_p11), %s1184_s3, 4096, %s192_s6, [#allocation6], %s1188_s13, %s1188_s13, %s935_s14  }
  0x2b   : > { %s1046_s17 = sadd.s32 1, %s928_s21   ;;  %s29_s27 = sadd.s32 1, %s924_s20 }
  0x2c   : > { %s26_s23 = ssub.s32 %s928_s21, %s1046_s17  ;;  %p36_p2 = scmp.ne.s32.totalorder %s924_s20, %s920_s19 }
  0x2d   : > { %p27_p1 = scmp.eq.s32.totalorder %s26_s23, 0  ;;  %p37_p6 = scmp.eq.s32.totalorder %s928_s21, 0 }
  0x2e   : > { %p1196_p3 = scmp.eq.s32.totalorder %s992_s22, 1  ;;  %p727_p9 = scmp.lt.s32.totalorder %s928_s21, 2 }
  0x2f   : > { %s1055_s28 = scalar_select %p27_p1, %s924_s20, %s29_s27  }
  0x30   : > { %p38_p12 = por %p37_p6, %p36_p2  ;;  %p1059_p7 = por %p1196_p3, %p36_p2 }
  0x31   : > { %s208_s30 = sand.u32 1, %s924_s20   ;;  %s658_s6 = sshll.u32 %s928_s21, 8 }
  0x32   : > { %s1197_s29 = scalar_select %p1059_p7, 1, 0 }
  0x33   : > { %s644_s7 = sshll.u32 %s208_s30, 4  ;;  %s1069_s10 = scalar_lea.hbm %s1181_s0, %s658_s6 }
  0x34   : > { %s212_s11 = scalar_lea.vmem [#allocation2], %s644_s7  ;;  %p1073_p11 = pnand %p727_p9, %p38_p12 }
  0x35   : > { %s219_s12 = sshll.u32 %s212_s11, 4  ;;  %s1077_s16 = scalar_lea.sflag [#allocation3], %s208_s30  ;;  %s1071_s12 = int_to_ptr.vmem [resolvable:$true] %s219_s12 }
  0x36   : > { %s832_s23 = scalar_lea.hbm %s1069_s10, 256  ;;  %p834_p0 = pneg %p1073_p11 }
  0x37   : > { %p833_p13 = scmp.ne.s32.totalorder %s1069_s10, %s832_s23  ;;  %s837_s7 = scalar_lea.hbm %s1181_s0, 512 }
  0x38   : > { %p838_p1 = scmp.lt.s32.totalorder %s1069_s10, %s1181_s0  ;;  %p839_p2 = scmp.lt.s32.totalorder %s837_s7, %s832_s23 }
  0x39   : > { %p835_p5 = pnand %p834_p0, %p833_p13 }
  0x3a   : > { %p840_p6 = por %p839_p2, %p838_p1 }
  0x3b   : > { %p836_p10 = pneg %p835_p5 }
  0x3d   : > { %p841_p12 = pnand %p840_p6, %p836_p10 }
  0x3f   : > { %844 = shalt.err (!%p841_p12)
}
  0x40   : > { %s845_s30 = scalar_lea.vmem %s1071_s12, 256  ;;  %s936_s11 = smov [#allocation2]  }
  0x41   : > { %p846_p3 = scmp.ne.s32.totalorder %s1071_s12, %s845_s30  ;;  %s850_s13 = sshll.u32 %s936_s11, 4  ;;  %s851_s13 = int_to_ptr.vmem [resolvable:$false] %s850_s13 }
  0x42   : > { %s852_s27 = scalar_lea.vmem %s851_s13, 512  ;;  %p853_p5 = scmp.lt.s32.totalorder %s1071_s12, %s851_s13 }
  0x43   : > { %p848_p9 = pnand %p846_p3, %p834_p0  ;;  %p854_p7 = scmp.lt.s32.totalorder %s852_s27, %s845_s30 }
  0x45   : > { %p849_p13 = pneg %p848_p9  ;;  %p855_p4 = por %p854_p7, %p853_p5 }
  0x47   : > { %p856_p8 = pnand %p855_p4, %p849_p13 }
  0x49   : > { %859 = shalt.err (!%p856_p8)
}
  0x4a   : > { %s1199_s23 = smov 128   ;;  %p1200_p0 = scmp.ne.s32.totalorder %s1194_s26, 0 }
  0x4b   : > { %720 = dma.hbm_to_vmem [thread:$0]  (!%p1073_p11), %s1069_s10, 256, %s1071_s12, %s1077_s16, %s1199_s23, %s1199_s23, %s935_s14  }
  0x4c   : > { %231 = sbr.rel (%p1200_p0) target bundleno = 553 (0x229), region = 40  ;;  %s1104_s6 = sand.u32 (!%p1200_p0), 1, %s920_s19  }
  0x4d   : > { %s648_s13 = sshll.u32 (!%p1200_p0), %s1104_s6, 4  ;;  %s234_s7 = scalar_lea.sflag (!%p1200_p0), [#allocation3], %s1104_s6 }
  0x4e   : > { %s1110_s15 = scalar_lea.vmem (!%p1200_p0), [#allocation2], %s648_s13  ;;  %p1201_p4 = scmp.ne.s32.totalorder (!%p1200_p0), %s1192_s24, 0 }
  0x51   : > { %903 = dma.done.wait (%p1201_p4), %s234_s7, 256  }
  0x52   : > { %905 = vsyncadd (%p1201_p4), %s234_s7, 4294967040  ;;  %p1202_p8 = scmp.eq.s32.totalorder %s992_s22, 0 }
  0x54   : > { %907 = dma.done.wait (%p1202_p8), [#allocation6], 8192   ;;  %p1203_p7 = pmov %p1202_p8 }
  0x55   : > { %v937_v0 = vmov 0.0   ;;  %v307_v1 = vld [vmem:[#allocation5 + $0xf8] sm:$0xff]  ;;  %v306_v2 = vld [vmem:[#allocation5 + $0xf0] sm:$0xff]  ;;  %v305_v3 = vld [vmem:[#allocation5 + $0xe8] sm:$0xff]  ;;  %s271_s12 = scalar_lea.vmem [#allocation8], %s648_s13  ;;  %s659_s8 = sshll.u32 %s992_s22, 8 }
  0x56   : > { %909 = vsyncadd (%p1203_p7), [#allocation6], 4294959104  ;;  %384 = vmatprep.mubr.f32.mxu0 %v937_v0  ;;  %320 = vmatprep.subr.mxu0 %v307_v1  ;;  %v304_v4 = vld [vmem:[#allocation5 + $0xe0] sm:$0xff]  ;;  %v303_v5 = vld [vmem:[#allocation5 + $0xd8] sm:$0xff]  ;;  %s547_s16 = sshll.u32 %s271_s12, 4  ;;  %s1138_s11 = scalar_lea.hbm %s1186_s5, %s659_s8  ;;  %s1133_s16 = int_to_ptr.vmem [resolvable:$true] %s547_s16 }
  0x57   : > { %321 = vmatpush1.msra.mxu0 %v306_v2  ;;  %v302_v6 = vld [vmem:[#allocation5 + $0xd0] sm:$0xff]  ;;  %v301_v7 = vld [vmem:[#allocation5 + $0xc8] sm:$0xff]  ;;  %v300_v8 = vld [vmem:[#allocation5 + $0xc0] sm:$0xff]  ;;  %s534_s27 = scalar_lea.sflag [#allocation4], %s1104_s6  ;;  %s860_s23 = scalar_lea.vmem %s1133_s16, 256 }
  0x58   : > { %322 = vmatprep.subr.mxu0 %v305_v3  ;;  %v299_v9 = vld [vmem:[#allocation5 + $0xb8] sm:$0xff]  ;;  %v298_v10 = vld [vmem:[#allocation5 + $0xb0] sm:$0xff]  ;;  %v297_v11 = vld [vmem:[#allocation5 + $0xa8] sm:$0xff]  ;;  %v310_v3 = vlaneseq  ;;  %p861_p11 = scmp.ne.s32.totalorder %s1133_s16, %s860_s23  ;;  %p1204_p10 = scmp.ne.s32.totalorder %s1197_s29, 0 }
  0x59   : > { %323 = vmatpush1.msra.mxu0 %v304_v4  ;;  %v296_v12 = vld [vmem:[#allocation5 + $0xa0] sm:$0xff]  ;;  %v295_v13 = vld [vmem:[#allocation5 + $0x98] sm:$0xff]  ;;  %v294_v14 = vld [vmem:[#allocation5 + $0x90] sm:$0xff]  ;;  %s938_s22 = smov [#allocation8]  }
  0x5a   : > { %324 = vmatprep.subr.mxu0 %v303_v5  ;;  %v448_v15 = vld [vmem:[#allocation7 + $0xf8] sm:$0xff]  ;;  %v293_v17 = vld [vmem:[#allocation5 + $0x88] sm:$0xff]  ;;  %v447_v18 = vld [vmem:[#allocation7 + $0xf0] sm:$0xff]  ;;  %v311_v4 = vshrl.u32 %v310_v3, 7  ;;  %p862_p1 = pnand %p861_p11, %p1204_p10  ;;  %s864_s13 = sshll.u32 %s938_s22, 4  ;;  %s865_s13 = int_to_ptr.vmem [resolvable:$false] %s864_s13 }
  0x5b   : > { %325 = vmatpush1.msra.mxu0 %v302_v6  ;;  %v432_v16 = vld [vmem:[#allocation7 + $0x78] sm:$0xff]  ;;  %660 = vmatprep.subr.mxu1 %v448_v15  ;;  %v431_v19 = vld [vmem:[#allocation7 + $0x70] sm:$0xff]  ;;  %v292_v20 = vld [vmem:[#allocation5 + $0x80] sm:$0xff]  ;;  %s866_s7 = scalar_lea.vmem %s865_s13, 512  ;;  %p867_p6 = scmp.lt.s32.totalorder %s1133_s16, %s865_s13 }
  0x5c   : > { %326 = vmatprep.subr.mxu0 %v301_v7  ;;  %661 = vmatpush3.msra.mxu1 %v432_v16  ;;  %v446_v21 = vld [vmem:[#allocation7 + $0xe8] sm:$0xff]  ;;  %v291_v22 = vld [vmem:[#allocation5 + $0x78] sm:$0xff]  ;;  %v290_v24 = vld [vmem:[#allocation5 + $0x70] sm:$0xff]  ;;  %v312_v5 = vsub.s32 0, %v311_v4  ;;  %v316_v7 = vsub.s32 1, %v311_v4  ;;  %p863_p2 = pneg %p862_p1  ;;  %p868_p12 = scmp.lt.s32.totalorder %s866_s7, %s860_s23 }
  0x5d   : > { %327 = vmatpush1.msra.mxu0 %v300_v8  ;;  %662 = vmatprep.subr.mxu1 %v447_v18  ;;  %v430_v23 = vld [vmem:[#allocation7 + $0x68] sm:$0xff]  ;;  %v288_v26 = vld [vmem:[#allocation5 + $0x60] sm:$0xff]  ;;  %v287_v27 = vld [vmem:[#allocation5 + $0x58] sm:$0xff] }
  0x5e   : > { %328 = vmatprep.subr.mxu0 %v299_v9  ;;  %663 = vmatpush3.msra.mxu1 %v431_v19  ;;  %v289_v25 = vld [vmem:[#allocation5 + $0x68] sm:$0xff]  ;;  %v286_v28 = vld [vmem:[#allocation5 + $0x50] sm:$0xff]  ;;  %v284_v30 = vld [vmem:[#allocation5 + $0x40] sm:$0xff]  ;;  %p869_p3 = por %p868_p12, %p867_p6 }
  0x5f   : > { %329 = vmatpush1.msra.mxu0 %v298_v10  ;;  %664 = vmatprep.subr.mxu1 %v446_v21  ;;  %v285_v29 = vld [vmem:[#allocation5 + $0x48] sm:$0xff]  ;;  %v283_v31 = vld [vmem:[#allocation5 + $0x38] sm:$0xff]  ;;  %v282_v32 = vld [vmem:[#allocation5 + $0x30] sm:$0xff] }
  0x60   : > { %330 = vmatprep.subr.mxu0 %v297_v11  ;;  %665 = vmatpush3.msra.mxu1 %v430_v23  ;;  %v281_v33 = vld [vmem:[#allocation5 + $0x28] sm:$0xff]  ;;  %v280_v34 = vld [vmem:[#allocation5 + $0x20] sm:$0xff]  ;;  %v279_v35 = vld [vmem:[#allocation5 + $0x18] sm:$0xff]  ;;  %p870_p9 = pnand %p869_p3, %p863_p2 }
  0x61   : > { %331 = vmatpush1.msra.mxu0 %v296_v12  ;;  %v278_v36 = vld [vmem:[#allocation5 + $0x10] sm:$0xff]  ;;  %v277_v37 = vld [vmem:[#allocation5 + $0x8] sm:$0xff]  ;;  %v276_v38 = vld [vmem:[#allocation5] sm:$0xff] }
  0x62   : > { %332 = vmatprep.subr.mxu0 %v295_v13  ;;  %v274_v39 = vld [vmem:[%s1110_s15] sm:$0xff]  ;;  %v275_v40 = vld [vmem:[%s1110_s15 + $0x8] sm:$0xff] }
  0x63   : > { %333 = vmatpush1.msra.mxu0 %v294_v14  ;;  %v445_v41 = vld [vmem:[#allocation7 + $0xe0] sm:$0xff]  ;;  %v444_v43 = vld [vmem:[#allocation7 + $0xd8] sm:$0xff]  ;;  %v443_v45 = vld [vmem:[#allocation7 + $0xd0] sm:$0xff] }
  0x64   : > { %334 = vmatprep.subr.mxu0 %v293_v17  ;;  %666 = vmatprep.subr.mxu1 %v445_v41  ;;  %v429_v42 = vld [vmem:[#allocation7 + $0x60] sm:$0xff]  ;;  %v428_v44 = vld [vmem:[#allocation7 + $0x58] sm:$0xff]  ;;  %v427_v46 = vld [vmem:[#allocation7 + $0x50] sm:$0xff] }
  0x65   : > { %335 = vmatpush1.msra.mxu0 %v292_v20  ;;  %667 = vmatpush3.msra.mxu1 %v429_v42  ;;  %v442_v47 = vld [vmem:[#allocation7 + $0xc8] sm:$0xff]  ;;  %v441_v49 = vld [vmem:[#allocation7 + $0xc0] sm:$0xff]  ;;  %v440_v51 = vld [vmem:[#allocation7 + $0xb8] sm:$0xff] }
  0x66   : > { %336 = vmatprep.subr.mxu0 %v291_v22  ;;  %668 = vmatprep.subr.mxu1 %v444_v43  ;;  %v426_v48 = vld [vmem:[#allocation7 + $0x48] sm:$0xff]  ;;  %v425_v50 = vld [vmem:[#allocation7 + $0x40] sm:$0xff]  ;;  %v424_v52 = vld [vmem:[#allocation7 + $0x38] sm:$0xff] }
  0x67   : > { %337 = vmatpush1.msra.mxu0 %v290_v24  ;;  %669 = vmatpush3.msra.mxu1 %v428_v44  ;;  %v439_v53 = vld [vmem:[#allocation7 + $0xb0] sm:$0xff]  ;;  %v438_v55 = vld [vmem:[#allocation7 + $0xa8] sm:$0xff]  ;;  %v437_v57 = vld [vmem:[#allocation7 + $0xa0] sm:$0xff] }
  0x68   : > { %338 = vmatprep.subr.mxu0 %v289_v25  ;;  %670 = vmatprep.subr.mxu1 %v443_v45  ;;  %v423_v54 = vld [vmem:[#allocation7 + $0x30] sm:$0xff]  ;;  %v422_v56 = vld [vmem:[#allocation7 + $0x28] sm:$0xff]  ;;  %v421_v58 = vld [vmem:[#allocation7 + $0x20] sm:$0xff] }
  0x69   : > { %339 = vmatpush1.msra.mxu0 %v288_v26  ;;  %671 = vmatpush3.msra.mxu1 %v427_v46  ;;  %v436_v59 = vld [vmem:[#allocation7 + $0x98] sm:$0xff]  ;;  %v435_v61 = vld [vmem:[#allocation7 + $0x90] sm:$0xff]  ;;  %v434_v63 = vld [vmem:[#allocation7 + $0x88] sm:$0xff] }
  0x6a   : > { %340 = vmatprep.subr.mxu0 %v287_v27  ;;  %672 = vmatprep.subr.mxu1 %v442_v47  ;;  %v420_v60 = vld [vmem:[#allocation7 + $0x18] sm:$0xff]  ;;  %v419_v62 = vld [vmem:[#allocation7 + $0x10] sm:$0xff]  ;;  %v433_v1 = vld [vmem:[#allocation7 + $0x80] sm:$0xff] }
  0x6b   : > { %341 = vmatpush1.msra.mxu0 %v286_v28  ;;  %673 = vmatpush3.msra.mxu1 %v426_v48  ;;  %v417_v2 = vld [vmem:[#allocation7] sm:$0xff] }
  0x6c   : > { %342 = vmatprep.subr.mxu0 %v285_v29  ;;  %674 = vmatprep.subr.mxu1 %v441_v49  ;;  %v308_v6 = vld [vmem:[%s1183_s2] sm:$0x3] }
  0x6d   : > { %343 = vmatpush1.msra.mxu0 %v284_v30  ;;  %675 = vmatpush3.msra.mxu1 %v425_v50  ;;  %v313_v8 = vrot.slane %v308_v6, %v312_v5  ;;  %v317_v9 = vrot.slane %v308_v6, %v316_v7 }
  0x6e   : > { %344 = vmatprep.subr.mxu0 %v283_v31  ;;  %676 = vmatprep.subr.mxu1 %v440_v51 }
  0x6f   : > { %345 = vmatpush1.msra.mxu0 %v282_v32  ;;  %677 = vmatpush3.msra.mxu1 %v424_v52 }
  0x70   : > { %346 = vmatprep.subr.mxu0 %v281_v33  ;;  %678 = vmatprep.subr.mxu1 %v439_v53 }
  0x71   : > { %347 = vmatpush1.msra.mxu0 %v280_v34  ;;  %679 = vmatpush3.msra.mxu1 %v423_v54 }
  0x72   : > { %348 = vmatprep.subr.mxu0 %v279_v35  ;;  %680 = vmatprep.subr.mxu1 %v438_v55 }
  0x73   : > { %349 = vmatpush1.msra.mxu0 %v278_v36  ;;  %681 = vmatpush3.msra.mxu1 %v422_v56 }
  0x74   : > { %350 = vmatprep.subr.mxu0 %v277_v37  ;;  %682 = vmatprep.subr.mxu1 %v437_v57 }
  0x75   : > { %351 = vmatpush1.msra.mxu0 %v276_v38  ;;  %683 = vmatpush3.msra.mxu1 %v421_v58 }
  0x76   : > { %385 = vmatmul.mubr.f32.vlgmr.msra.gmra.mxu0 %v274_v39  ;;  %684 = vmatprep.subr.mxu1 %v436_v59  ;;  %v652_v39 = vld [vmem:[%s1185_s4] ss:$0 sm:$0xff] }
  0x77   : > { %390 = vmatprep.mubr.f32.mxu0 %v937_v0  ;;  %685 = vmatpush3.msra.mxu1 %v420_v60  ;;  %v418_v0 = vld [vmem:[#allocation7 + $0x8] sm:$0xff] }
  0x78   : > { %686 = vmatprep.subr.mxu1 %v435_v61 }
  0x79   : > { %687 = vmatpush3.msra.mxu1 %v419_v62 }
  0x7a   : > { %391 = vmatmul.mubr.f32.gmra.mxu0 %v275_v40  ;;  %688 = vmatprep.subr.mxu1 %v434_v63 }
  0x7b   : > { %689 = vmatpush3.msra.mxu1 %v418_v0 }
  0x7c   : > { %690 = vmatprep.subr.mxu1 %v433_v1 }
  0x7d   : > { %691 = vmatpush3.msra.mxu1 %v417_v2 }
 0x136   : > { %v386_v10 = vpop.f32.mrf.mxu0 }
 0x137   : > { %v387_v11 = vadd.f32 %v386_v10, %v313_v8 }
 0x138   : > { %v388_v12 = vpop.f32.mrf.mxu0 }
 0x139   : > { %v401_v13 = vmul.f32 0.70710677, %v387_v11  ;;  %v389_v14 = vadd.f32 %v388_v12, %v317_v9  ;;  %v397_v28 = vmul.f32 0.5, %v387_v11 }
 0x13a   : > { %v392_v15 = vpop.f32.mrf.mxu0 }
 0x13b   : > { %772 = verf.f32 %v401_v13  ;;  %v402_v16 = vmul.f32 0.70710677, %v389_v14  ;;  %v393_v17 = vadd.f32 %v392_v15, %v313_v8  ;;  %v398_v25 = vmul.f32 0.5, %v389_v14 }
 0x13c   : > { %v394_v18 = vpop.f32.mrf.mxu0 }
 0x13d   : > { %774 = verf.f32 %v402_v16  ;;  %v403_v19 = vmul.f32 0.70710677, %v393_v17  ;;  %v395_v20 = vadd.f32 %v394_v18, %v317_v9  ;;  %v399_v35 = vmul.f32 0.5, %v393_v17 }
 0x13f   : > { %776 = verf.f32 %v403_v19  ;;  %v404_v21 = vmul.f32 0.70710677, %v395_v20  ;;  %v400_v33 = vmul.f32 0.5, %v395_v20 }
 0x141   : > { %778 = verf.f32 %v404_v21 }
 0x148   : > { %v773_v22 = vpop.eup %772 }
 0x149   : > { %v409_v24 = vadd.f32 1.0, %v773_v22 }
 0x14a   : > { %v775_v23 = vpop.eup %774 }
 0x14b   : > { %v410_v26 = vadd.f32 1.0, %v775_v23  ;;  %v413_v31 = vmul.f32 %v409_v24, %v397_v28 }
 0x14c   : > { %v777_v27 = vpop.eup %776 }
 0x14d   : > { %v414_v29 = vmul.f32 %v410_v26, %v398_v25  ;;  %v411_v32 = vadd.f32 1.0, %v777_v27 }
 0x14e   : > { %v779_v30 = vpop.eup %778 }
 0x14f   : > { %520 = vmatprep.mubr.f32.mxu1 %v414_v29  ;;  %v412_v34 = vadd.f32 1.0, %v779_v30  ;;  %v415_v37 = vmul.f32 %v411_v32, %v399_v35 }
 0x150   : > { %521 = vmatmul.mubr.f32.vlgmr.msra.gmra.mxu1 %v413_v31 }
 0x151   : > { %v416_v36 = vmul.f32 %v412_v34, %v400_v33 }
 0x153   : > { %525 = vmatprep.mubr.f32.mxu1 %v416_v36 }
 0x154   : > { %526 = vmatmul.mubr.f32.gmra.mxu1 %v415_v37 }
 0x210   : > { %v692_v38 = vpop.f32.mrf.mxu1 }
 0x212   : > { %v693_v40 = vpop.f32.mrf.mxu1 }
 0x213   : > { %v694_v41 = vadd.f32 %v693_v40, %v692_v38 }
 0x214   : > { %v695_v42 = vpop.f32.mrf.mxu1 }
 0x215   : > { %v523_v43 = vadd.f32 %v694_v41, %v652_v39 }
 0x216   : > { %v696_v44 = vpop.f32.mrf.mxu1 }
 0x217   : > { %531 = vst [vmem:[%s271_s12] sm:$0xff] %v523_v43  ;;  %v697_v45 = vadd.f32 %v696_v44, %v695_v42 }
 0x219   : > { %v528_v46 = vadd.f32 %v697_v45, %v652_v39 }
 0x21b   : > { %532 = vst [vmem:[%s271_s12 + $0x8] sm:$0xff] %v528_v46 }
 0x21c   : > { %873 = shalt.err (!%p870_p9)
}
 0x21d   : > { %s874_s15 = scalar_lea.hbm %s1138_s11, 256  ;;  %s878_s14 = scalar_lea.hbm %s1186_s5, 512 }
 0x21e   : > { %p875_p13 = scmp.ne.s32.totalorder %s1138_s11, %s874_s15  ;;  %p879_p4 = scmp.lt.s32.totalorder %s1138_s11, %s1186_s5 }
 0x21f   : > { %p880_p8 = scmp.lt.s32.totalorder %s878_s14, %s874_s15 }
 0x220   : > { %p876_p5 = pnand %p875_p13, %p1204_p10 }
 0x221   : > { %p881_p7 = por %p880_p8, %p879_p4 }
 0x222   : > { %p877_p0 = pneg %p876_p5 }
 0x224   : > { %p882_p11 = pnand %p881_p7, %p877_p0 }
 0x226   : > { %885 = shalt.err (!%p882_p11)
}
 0x227   : > { %s939_s8 = smov 128   ;;  %s940_s9 = smov 8  }
 0x228   : > { %708 = dma.vmem_to_hbm [thread:$0]  (%p1204_p10), %s1133_s16, 256, %s1138_s11, %s534_s27, %s939_s8, %s939_s8, %s940_s9  }
 0x229 PF: > { %s562_s30 = sand.u32 1, %s916_s18   ;;  %p1205_p1 = scmp.ne.s32.totalorder %s1193_s25, 0 }
 0x22a   : > { %p1206_p2 = scmp.ge.s32.totalorder %s928_s21, 2  ;;  %s563_s23 = scalar_lea.sflag [#allocation4], %s562_s30 }
 0x22c   : > { %p722_p6 = pnand %p1206_p2, %p1205_p1 }
 0x22e   : > { %p723_p12 = pneg %p722_p6 }
 0x230   : > { %911 = dma.done.wait (%p723_p12), %s563_s23, 256  }
 0x231   : > { %913 = vsyncadd (%p723_p12), %s563_s23, 4294967040  ;;  %p19_p3 = scmp.ge.s32.totalorder %s1046_s17, 4   ;;  %s1207_s18 = smov %s920_s19 }
 0x232   : > { %s1208_s19 = smov %s924_s20  ;;  %s1209_s20 = smov %s1055_s28 }
 0x233   : > { %s1210_s21 = smov %s1046_s17  ;;  %21 = sbr.rel (!%p19_p3) target bundleno = 6 (0x6), region = 93 }
 0x238   :  { %568 = vsyncpa [#allocation3], 1 }
 0x239   :  { %570 = vsyncpa [#allocation3 + $0x1], 1 }
 0x23a   :  { %571 = vsyncpa [#allocation6], 1 }
 0x23b   :  { %572 = vsyncpa [#allocation4], 1 }
 0x23c   :  { %574 = vsyncpa [#allocation4 + $0x1], 1 }

</bundles_post_ra>
